<compile_context>
chip_gen: v5e
topology: v5e:2x2
jax: 0.10.0
libtpu: 0.0.40
codegen_flags: <defaults>
</compile_context>

<pallas_src>
import functools

import jax
import jax.numpy as jnp
from jax.experimental import pallas as pl
from jax.experimental.pallas import tpu as pltpu

LANE = 128  # TPU vreg lane width; last dim of every tile.


# --------------------------- kernel math helpers ------------------------------
def _pow(x, gamma):
    """x ** gamma with small integer gammas lowered to plain multiplies."""
    g = float(gamma)
    if g.is_integer() and 0 <= g <= 8:
        n = int(g)
        if n == 0:
            return jnp.ones_like(x)
        y = x
        for _ in range(n - 1):
            y = y * x
        return y
    # Non-integer exponent: exp/log on the EUP; clamp to avoid log(0).
    return jnp.exp(g * jnp.log(jnp.maximum(x, 1e-30)))


def _focal_elements(x, t, pw, gamma, alpha):
    """Elementwise focal loss (no reduction), numerically stable, f32 math."""
    # softplus(-x) = max(-x, 0) + log1p(exp(-|x|))
    sp_negx = jnp.maximum(-x, 0.0) + jnp.log1p(jnp.exp(-jnp.abs(x)))
    if pw is None:
        bce = (1.0 - t) * x + sp_negx
    else:
        bce = (1.0 - t) * x + ((pw - 1.0) * t + 1.0) * sp_negx
    pt = jnp.exp(-bce)
    fl = _pow(1.0 - pt, gamma) * bce
    if alpha is not None:
        fl = jnp.float32(alpha) * fl
    return fl


# ------------------------------ Pallas kernels --------------------------------
def _reduce_flat_kernel(x_ref, t_ref, out_ref, *, gamma, alpha, tm, n_valid):
    """Flat lane-dense tile -> (8, LANE) partial sum; mask computed in-kernel."""
    i = pl.program_id(0)
    x = x_ref[...].astype(jnp.float32)
    t = t_ref[...].astype(jnp.float32)
    fl = _focal_elements(x, t, None, gamma, alpha)
    row = jax.lax.broadcasted_iota(jnp.int32, fl.shape, 0)
    lane = jax.lax.broadcasted_iota(jnp.int32, fl.shape, 1)
    gidx = (i * tm + row) * LANE + lane          # global flattened element index
    fl = jnp.where(gidx < n_valid, fl, 0.0)
    # Sublane-split reduce to a vreg-shaped (8, LANE) partial; the final tiny
    # cross-lane reduce over all tiles happens once in the wrapper.
    out_ref[0] = jnp.sum(fl.reshape(tm // 8, 8, LANE), axis=0)


def _reduce_pw_kernel(x_ref, t_ref, pw_ref, out_ref, *, gamma, alpha, tm,
                      n_rows, n_cols, c_pad):
    """(rows, C_pad) tile with resident (1, C_pad) pos_weight -> (8, C_pad) partial."""
    i = pl.program_id(0)
    x = x_ref[...].astype(jnp.float32)
    t = t_ref[...].astype(jnp.float32)
    pw = pw_ref[...].astype(jnp.float32)          # (1, C_pad) broadcasts over rows
    fl = _focal_elements(x, t, pw, gamma, alpha)
    row = jax.lax.broadcasted_iota(jnp.int32, fl.shape, 0) + i * tm
    col = jax.lax.broadcasted_iota(jnp.int32, fl.shape, 1)
    fl = jnp.where((row < n_rows) & (col < n_cols), fl, 0.0)
    out_ref[0] = jnp.sum(fl.reshape(tm // 8, 8, c_pad), axis=0)


def _eltwise_flat_kernel(x_ref, t_ref, out_ref, *, gamma, alpha):
    x = x_ref[...].astype(jnp.float32)
    t = t_ref[...].astype(jnp.float32)
    out_ref[...] = _focal_elements(x, t, None, gamma, alpha).astype(out_ref.dtype)


def _eltwise_pw_kernel(x_ref, t_ref, pw_ref, out_ref, *, gamma, alpha):
    x = x_ref[...].astype(jnp.float32)
    t = t_ref[...].astype(jnp.float32)
    pw = pw_ref[...].astype(jnp.float32)
    out_ref[...] = _focal_elements(x, t, pw, gamma, alpha).astype(out_ref.dtype)


# ------------------------------ host wrapper -----------------------------------
def _float_stream(a):
    """Stream floats in their native dtype (bf16 stays bf16); ints/bools -> f32."""
    a = jnp.asarray(a)
    if jnp.issubdtype(a.dtype, jnp.floating):
        return a
    return a.astype(jnp.float32)


def _row_align(*dtypes):
    """Sublane packing granularity for the narrowest streamed dtype."""
    min_item = min(jnp.dtype(d).itemsize for d in dtypes)
    return max(8, 32 // max(min_item, 1))        # f32 -> 8, bf16 -> 16, int8 -> 32


def focal_loss(logits, targets, *, gamma=2.0, alpha=None, reduction='mean',
               pos_weight=None, block_rows=1024):
    """Pallas FocalLoss forward matching the PyTorch module's semantics."""
    orig_shape = tuple(jnp.shape(logits))
    x = _float_stream(logits)
    t = _float_stream(targets)
    n_elem = int(x.size)
    if n_elem == 0:
        raise ValueError("empty input")
    if reduction not in ('mean', 'sum', 'none'):
        raise ValueError(f"unknown reduction: {reduction!r}")

    align = _row_align(x.dtype, t.dtype)
    par = pltpu.CompilerParams(dimension_semantics=("parallel",))

    # ----------------------- pos_weight path: class axis = lane axis -----------
    if pos_weight is not None:
        C = orig_shape[-1] if len(orig_shape) >= 1 else 1
        R = n_elem // C
        C_pad = pl.cdiv(C, LANE) * LANE
        pw_row = jnp.broadcast_to(jnp.asarray(pos_weight, jnp.float32), (C,))
        if C_pad == C:
            pw2 = pw_row.reshape(1, C_pad)
        else:
            pw2 = jnp.pad(pw_row, (0, C_pad - C)).reshape(1, C_pad)

        # Row tile sized for roughly block_rows*LANE f32 elements per stream.
        # TODO(synk): for extremely wide trailing dims (C_pad*8*4B*streams > scoped
        # VMEM) one would also shard the lane axis; not needed for typical C.
        tm = (int(block_rows) * LANE) // C_pad
        tm = max(align, (tm // align) * align)
        tm = min(tm, pl.cdiv(max(R, 1), align) * align)
        R_pad = pl.cdiv(max(R, 1), tm) * tm

        def pack(v):
            v2 = v.reshape(R, C)
            if R_pad == R and C_pad == C:
                return v2
            return jnp.pad(v2, ((0, R_pad - R), (0, C_pad - C)))

        x2, t2 = pack(x), pack(t)
        grid = (R_pad // tm,)
        xt_spec = pl.BlockSpec((tm, C_pad), lambda i: (i, 0))
        pw_spec = pl.BlockSpec((1, C_pad), lambda i: (0, 0))   # resident, one DMA

        if reduction in ('mean', 'sum'):
            kern = functools.partial(_reduce_pw_kernel, gamma=gamma, alpha=alpha,
                                     tm=tm, n_rows=R, n_cols=C, c_pad=C_pad)
            partials = pl.pallas_call(
                kern,
                out_shape=jax.ShapeDtypeStruct((grid[0], 8, C_pad), jnp.float32),
                grid=grid,
                in_specs=[xt_spec, xt_spec, pw_spec],
                out_specs=pl.BlockSpec((1, 8, C_pad), lambda i: (i, 0, 0)),
                compiler_params=par,
            )(x2, t2, pw2)
            total = jnp.sum(partials)
            return total / jnp.float32(n_elem) if reduction == 'mean' else total

        # reduction == 'none'
        kern = functools.partial(_eltwise_pw_kernel, gamma=gamma, alpha=alpha)
        out2 = pl.pallas_call(
            kern,
            out_shape=jax.ShapeDtypeStruct((R_pad, C_pad), jnp.float32),
            grid=grid,
            in_specs=[xt_spec, xt_spec, pw_spec],
            out_specs=xt_spec,
            compiler_params=par,
        )(x2, t2, pw2)
        return out2[:R, :C].reshape(orig_shape)

    # ----------------------- no pos_weight: flat lane-dense packing ------------
    xf = x.reshape(-1)
    tf = t.reshape(-1)
    rows = pl.cdiv(n_elem, LANE)
    tm = min(int(block_rows), pl.cdiv(rows, align) * align)
    tm = max(align, (tm // align) * align)
    rows_padded = pl.cdiv(rows, tm) * tm
    padded = rows_padded * LANE

    def pack(v):
        if padded == n_elem:                       # aligned fast path: free reshape
            return v.reshape(rows_padded, LANE)
        return jnp.pad(v, (0, padded - n_elem)).reshape(rows_padded, LANE)

    x2, t2 = pack(xf), pack(tf)
    grid = (rows_padded // tm,)
    tile_spec = pl.BlockSpec((tm, LANE), lambda i: (i, 0))

    if reduction in ('mean', 'sum'):
        kern = functools.partial(_reduce_flat_kernel, gamma=gamma, alpha=alpha,
                                 tm=tm, n_valid=n_elem)
        partials = pl.pallas_call(
            kern,
            out_shape=jax.ShapeDtypeStruct((grid[0], 8, LANE), jnp.float32),
            grid=grid,
            in_specs=[tile_spec, tile_spec],
            out_specs=pl.BlockSpec((1, 8, LANE), lambda i: (i, 0, 0)),
            compiler_params=par,
        )(x2, t2)
        total = jnp.sum(partials)
        return total / jnp.float32(n_elem) if reduction == 'mean' else total

    # reduction == 'none'
    kern = functools.partial(_eltwise_flat_kernel, gamma=gamma, alpha=alpha)
    out2 = pl.pallas_call(
        kern,
        out_shape=jax.ShapeDtypeStruct((rows_padded, LANE), jnp.float32),
        grid=grid,
        in_specs=[tile_spec, tile_spec],
        out_specs=tile_spec,
        compiler_params=par,
    )(x2, t2)
    return out2.reshape(-1)[:n_elem].reshape(orig_shape)


# ------------------------------ pure-JAX reference ------------------------------
def focal_loss_ref(logits, targets, gamma=2.0, alpha=None, reduction='mean',
                   pos_weight=None):
    x = jnp.asarray(logits, jnp.float32)
    t = jnp.asarray(targets, jnp.float32)
    sp_negx = jnp.maximum(-x, 0.0) + jnp.log1p(jnp.exp(-jnp.abs(x)))
    if pos_weight is None:
        bce = (1.0 - t) * x + sp_negx
    else:
        pw = jnp.asarray(pos_weight, jnp.float32)
        bce = (1.0 - t) * x + ((pw - 1.0) * t + 1.0) * sp_negx
    pt = jnp.exp(-bce)
    fl = (1.0 - pt) ** gamma * bce
    if alpha is not None:
        fl = alpha * fl
    if reduction == 'mean':
        return fl.mean()
    if reduction == 'sum':
        return fl.sum()
    return fl


# ------------------------------------ main --------------------------------------
if __name__ == "__main__":
    key = jax.random.PRNGKey(0)
    k1, k2, k3, k4 = jax.random.split(key, 4)

    B, C = 8, 32  # small multi-label batch (focal loss on per-label logits)
    logits = 2.0 * jax.random.normal(k1, (B, C), dtype=jnp.float32)
    targets = (jax.random.uniform(k2, (B, C)) < 0.3).astype(jnp.float32)
    pos_weight = jnp.linspace(0.5, 2.0, C, dtype=jnp.float32)

    # 1) Default config: gamma=2, alpha=None, reduction='mean', pos_weight=None.
    out_mean = jax.block_until_ready(focal_loss(logits, targets))
    ref_mean = focal_loss_ref(logits, targets)
    assert out_mean.shape == (), out_mean.shape
    assert jnp.allclose(out_mean, ref_mean, rtol=1e-5, atol=1e-6), (out_mean, ref_mean)

    # 2) alpha + pos_weight (resident class-axis block) + 'sum' reduction.
    out_sum = jax.block_until_ready(
        focal_loss(logits, targets, gamma=2.0, alpha=0.25, reduction='sum',
                   pos_weight=pos_weight))
    ref_sum = focal_loss_ref(logits, targets, gamma=2.0, alpha=0.25,
                             reduction='sum', pos_weight=pos_weight)
    assert jnp.allclose(out_sum, ref_sum, rtol=1e-5, atol=1e-4), (out_sum, ref_sum)

    # 3) reduction='none' (elementwise output), without and with pos_weight.
    out_none = jax.block_until_ready(focal_loss(logits, targets, reduction='none'))
    ref_none = focal_loss_ref(logits, targets, reduction='none')
    assert out_none.shape == logits.shape
    assert jnp.allclose(out_none, ref_none, rtol=1e-5, atol=1e-6)

    out_none_pw = jax.block_until_ready(
        focal_loss(logits, targets, reduction='none', alpha=0.5,
                   pos_weight=pos_weight))
    ref_none_pw = focal_loss_ref(logits, targets, reduction='none', alpha=0.5,
                                 pos_weight=pos_weight)
    assert jnp.allclose(out_none_pw, ref_none_pw, rtol=1e-5, atol=1e-6)

    # 4) Odd, non-lane-aligned shape -> exercises padding + in-kernel iota mask.
    l_odd = jax.random.normal(k3, (7, 37), dtype=jnp.float32)
    t_odd = (jax.random.uniform(k4, (7, 37)) < 0.5).astype(jnp.float32)
    out_odd = jax.block_until_ready(focal_loss(l_odd, t_odd))
    ref_odd = focal_loss_ref(l_odd, t_odd)
    assert jnp.allclose(out_odd, ref_odd, rtol=1e-5, atol=1e-6), (out_odd, ref_odd)

    pw_odd = jnp.linspace(0.5, 2.0, 37, dtype=jnp.float32)
    out_odd_pw = jax.block_until_ready(
        focal_loss(l_odd, t_odd, reduction='mean', pos_weight=pw_odd))
    ref_odd_pw = focal_loss_ref(l_odd, t_odd, reduction='mean', pos_weight=pw_odd)
    assert jnp.allclose(out_odd_pw, ref_odd_pw, rtol=1e-5, atol=1e-6), (out_odd_pw, ref_odd_pw)

    assert bool(jnp.isfinite(out_mean)) and bool(jnp.isfinite(out_sum))
    print("KERNEL_OK")
</pallas_src>

<mosaic_0001>
module attributes {stable_mosaic.version = 11 : i64} {
  func.func @_reduce_flat_kernel(%arg0: i32, %arg1: memref<8x128xf32, #tpu.memory_space<vmem>>, %arg2: memref<8x128xf32, #tpu.memory_space<vmem>>, %arg3: memref<1x8x128xf32, #tpu.memory_space<vmem>>) attributes {dimension_semantics = [#tpu.dimension_semantics<parallel>], iteration_bounds = array<i64: 1>, scalar_prefetch = 0 : i64, scratch_operands = 0 : i64, tpu.core_type = #tpu.core_type<tc>, window_params = [{transform_indices = @transform_0, window_bounds = array<i64: 8, 128>}, {transform_indices = @transform_1, window_bounds = array<i64: 8, 128>}, {transform_indices = @transform_2, window_bounds = array<i64: 1, 8, 128>}]} {
    %c0 = arith.constant 0 : index
    %c0_0 = arith.constant 0 : index
    %0 = vector.load %arg1[%c0, %c0_0] : memref<8x128xf32, #tpu.memory_space<vmem>>, vector<8x128xf32>
    %c0_1 = arith.constant 0 : index
    %c0_2 = arith.constant 0 : index
    %1 = vector.load %arg2[%c0_1, %c0_2] : memref<8x128xf32, #tpu.memory_space<vmem>>, vector<8x128xf32>
    %cst = arith.constant 0.000000e+00 : f32
    %2 = vector.broadcast %cst : f32 to vector<8x128xf32>
    %3 = arith.subf %2, %0 : vector<8x128xf32>
    %cst_3 = arith.constant 0.000000e+00 : f32
    %4 = vector.broadcast %cst_3 : f32 to vector<8x128xf32>
    %5 = arith.maximumf %3, %4 : vector<8x128xf32>
    %6 = math.absf %0 : vector<8x128xf32>
    %cst_4 = arith.constant 0.000000e+00 : f32
    %7 = vector.broadcast %cst_4 : f32 to vector<8x128xf32>
    %8 = arith.subf %7, %6 : vector<8x128xf32>
    %9 = math.exp %8 : vector<8x128xf32>
    %10 = math.log1p %9 : vector<8x128xf32>
    %11 = arith.addf %5, %10 : vector<8x128xf32>
    %cst_5 = arith.constant 1.000000e+00 : f32
    %12 = vector.broadcast %cst_5 : f32 to vector<8x128xf32>
    %13 = arith.subf %12, %1 : vector<8x128xf32>
    %14 = arith.mulf %13, %0 : vector<8x128xf32>
    %15 = arith.addf %14, %11 : vector<8x128xf32>
    %cst_6 = arith.constant 0.000000e+00 : f32
    %16 = vector.broadcast %cst_6 : f32 to vector<8x128xf32>
    %17 = arith.subf %16, %15 : vector<8x128xf32>
    %18 = math.exp %17 : vector<8x128xf32>
    %cst_7 = arith.constant 1.000000e+00 : f32
    %19 = vector.broadcast %cst_7 : f32 to vector<8x128xf32>
    %20 = arith.subf %19, %18 : vector<8x128xf32>
    %21 = arith.mulf %20, %20 : vector<8x128xf32>
    %22 = arith.mulf %21, %15 : vector<8x128xf32>
    %23 = tpu.iota {dimensions = array<i32: 0>} : vector<8x128xi32>
    %24 = tpu.iota {dimensions = array<i32: 1>} : vector<8x128xi32>
    %c8_i32 = arith.constant 8 : i32
    %25 = arith.muli %arg0, %c8_i32 : i32
    %26 = vector.broadcast %25 : i32 to vector<8x128xi32>
    %27 = arith.addi %26, %23 : vector<8x128xi32>
    %c128_i32 = arith.constant 128 : i32
    %28 = vector.broadcast %c128_i32 : i32 to vector<8x128xi32>
    %29 = arith.muli %27, %28 : vector<8x128xi32>
    %30 = arith.addi %29, %24 : vector<8x128xi32>
    %c256_i32 = arith.constant 256 : i32
    %31 = vector.broadcast %c256_i32 : i32 to vector<8x128xi32>
    %32 = arith.cmpi slt, %30, %31 : vector<8x128xi32>
    %cst_8 = arith.constant 0.000000e+00 : f32
    %33 = vector.broadcast %cst_8 : f32 to vector<8x128xf32>
    %34 = arith.select %32, %22, %33 : vector<8x128xi1>, vector<8x128xf32>
    %35 = vector.shape_cast %34 : vector<8x128xf32> to vector<1x8x128xf32>
    %cst_9 = arith.constant dense<0.000000e+00> : vector<8x128xf32>
    %36 = vector.multi_reduction <add>, %35, %cst_9 [0] : vector<1x8x128xf32> to vector<8x128xf32>
    %c0_10 = arith.constant 0 : index
    %c0_11 = arith.constant 0 : index
    %c0_12 = arith.constant 0 : index
    %37 = vector.load %arg3[%c0_10, %c0_11, %c0_12] : memref<1x8x128xf32, #tpu.memory_space<vmem>>, vector<1x8x128xf32>
    %38 = vector.shape_cast %37 : vector<1x8x128xf32> to vector<8x128xf32>
    %39 = vector.shape_cast %36 : vector<8x128xf32> to vector<1x8x128xf32>
    tpu.vector_store %arg3[%c0_10, %c0_11, %c0_12], %39 {strides = array<i32>} : memref<1x8x128xf32, #tpu.memory_space<vmem>>, vector<1x8x128xf32>,
    return
  }
  func.func @transform_0(%arg0: i32) -> (i32, i32) {
    %c0_i32 = arith.constant 0 : i32
    %c0_i32_0 = arith.constant 0 : i32
    return %arg0, %c0_i32 : i32, i32
  }
  func.func @transform_1(%arg0: i32) -> (i32, i32) {
    %c0_i32 = arith.constant 0 : i32
    %c0_i32_0 = arith.constant 0 : i32
    return %arg0, %c0_i32 : i32, i32
  }
  func.func @transform_2(%arg0: i32) -> (i32, i32, i32) {
    %c0_i32 = arith.constant 0 : i32
    %c0_i32_0 = arith.constant 0 : i32
    %c0_i32_1 = arith.constant 0 : i32
    return %arg0, %c0_i32, %c0_i32_0 : i32, i32, i32
  }
}

</mosaic_0001>

<bundles_post_ra>
// kernel: tpu_custom_call.1
= control target key start
LH: loop header
LB: loop body
LE: loop exit
PB: predicated region body
PF: predicated region fallthrough
CT: control target
= control target key end

     0   :  { %7 = vsyncpa [#allocation3], 0  ;;  %s212_s0 = inlined_call_operand.hbm [shape: f32[8,128], index: 0, kind: input, shape index: {}]   ;;  %s213_s1 = inlined_call_operand.hbm [shape: f32[8,128], index: 1, kind: input, shape index: {}]   ;;  %s214_s2 = inlined_call_operand.hbm [shape: f32[1,8,128], index: 2, kind: output, shape index: {}]  }
   0x1   :  { %8 = vsyncpa [#allocation6], 0 }
   0x2   :  { %9 = vsyncpa [#allocation4], 0  ;;  %s15_s11 = sshll.u32 %s212_s0, 4  ;;  %s185_s12 = smov [#allocation2]   ;;  %s16_s11 = int_to_ptr.hbm [resolvable:$true] %s15_s11 }
   0x3   :  { %s17_s13 = sshll.u32 %s185_s12, 4  ;;  %s26_s16 = sshll.u32 %s213_s1, 4  ;;  %s18_s13 = int_to_ptr.vmem [resolvable:$true] %s17_s13  ;;  %s27_s16 = int_to_ptr.hbm [resolvable:$true] %s26_s16 }
   0x4   :  { %20 = dma.hbm_to_vmem [thread:$0]  %s16_s11, 128, %s18_s13, [#allocation3]  }
   0x5   :  { %s186_s17 = smov [#allocation5]  }
   0x6   :  { %s28_s18 = sshll.u32 %s186_s17, 4  ;;  %s29_s18 = int_to_ptr.vmem [resolvable:$true] %s28_s18 }
   0x7   :  { %31 = dma.hbm_to_vmem [thread:$0]  %s27_s16, 128, %s29_s18, [#allocation6]  }
   0x8   :  { %179 = dma.done.wait [#allocation3], 128  }
   0x9   :  { %180 = vsyncadd [#allocation3], 4294967168 }
   0xa   :  { %181 = dma.done.wait [#allocation6], 128  }
   0xb   :  { %182 = vsyncadd [#allocation6], 4294967168  ;;  %v40_v0 = vld [vmem:[#allocation2] sm:$0xff]  ;;  %v41_v7 = vld [vmem:[#allocation5] sm:$0xff]  ;;  %v67_v20 = vlaneseq  ;;  %s187_s0 = smov [#allocation7]   ;;  %s87_s21 = sshll.u32 %s214_s2, 4  ;;  %s88_s21 = int_to_ptr.hbm [resolvable:$true] %s87_s21 }
   0xc   :  { %v44_v1 = vand.u32 2147483647, %v40_v0  ;;  %v42_v9 = vsub.f32 0.0, %v40_v0  ;;  %v58_v11 = vsub.f32 1.0, %v41_v7  ;;  %s85_s1 = sshll.u32 %s187_s0, 4  ;;  %s86_s1 = int_to_ptr.vmem [resolvable:$true] %s85_s1 }
   0xd   :  { %v68_v23 = vshrl.u32 %v67_v20, 7  ;;  %v70_v24 = vand.u32 127, %v67_v20 }
   0xe   :  { %v45_v2 = vsub.f32 0.0, %v44_v1  ;;  %v43_v14 = vmax.f32 %v42_v9, 0.0  ;;  %v59_v16 = vmul.f32 %v58_v11, %v40_v0 }
   0xf   :  { %v74_v25 = vmul.u32 128, %v68_v23 }
  0x10   :  { %v46_v3 = vmul.f32 1.442695, %v45_v2 }
  0x11   :  { %v75_v27 = vadd.s32 %v74_v25, %v70_v24 }
  0x12   :  { %101 = vpow2.f32 %v46_v3 }
  0x13   :  { %vm76_vm1 = vcmp.lt.s32.totalorder %v75_v27, 256 }
  0x18   :  { %v102_v4 = vpop.eup %101 }
  0x19   :  { %v48_v5 = vadd.f32 1.0, %v102_v4  ;;  %v51_v6 = vmul.f32 -0.5, %v102_v4  ;;  %v54_v10 = vand.u32 2147483647, %v102_v4 }
  0x1b   :  { %103 = vlog2.f32 %v48_v5  ;;  %v52_v8 = vadd.f32 1.0, %v51_v6  ;;  %vm55_vm0 = vcmp.lt.f32.partialorder %v54_v10, 0.0004427343 }
  0x1d   :  { %v53_v12 = vmul.f32 %v102_v4, %v52_v8 }
  0x21   :  { %v104_v13 = vpop.eup %103 }
  0x22   :  { %v50_v15 = vmul.f32 0.6931472, %v104_v13 }
  0x24   :  { %v56_v17 = vsel %vm55_vm0, %v53_v12, %v50_v15 }
  0x25   :  { %v57_v18 = vadd.f32 %v56_v17, %v43_v14 }
  0x27   :  { %v60_v19 = vadd.f32 %v59_v16, %v57_v18 }
  0x29   :  { %v61_v21 = vsub.f32 0.0, %v60_v19 }
  0x2b   :  { %v62_v22 = vmul.f32 1.442695, %v61_v21 }
  0x2d   :  { %105 = vpow2.f32 %v62_v22 }
  0x33   :  { %v106_v26 = vpop.eup %105 }
  0x34   :  { %v64_v28 = vsub.f32 1.0, %v106_v26 }
  0x36   :  { %v65_v29 = vmul.f32 %v64_v28, %v64_v28 }
  0x38   :  { %v66_v30 = vmul.f32 %v65_v29, %v60_v19 }
  0x3a   :  { %v77_v31 = vsel %vm76_vm1, %v66_v30, 0.0 }
  0x3b   :  { %79 = vst [vmem:[#allocation7] sm:$0xff] %v77_v31 }
  0x3c   :  { %90 = dma.vmem_to_hbm [thread:$0]  %s86_s1, 128, %s88_s21, [#allocation4]  }
  0x3d   :  { %183 = dma.done.wait [#allocation4], 128  }
  0x3e   :  { %184 = vsyncadd [#allocation4], 4294967168 }
  0x3f   :  { %95 = vsyncpa [#allocation3], 1 }
  0x40   :  { %96 = vsyncpa [#allocation6], 1 }
  0x41   :  { %97 = vsyncpa [#allocation4], 1 }

</bundles_post_ra>
